<compile_context>
chip_gen: v5e
topology: v5e:2x2
jax: 0.10.0
libtpu: 0.0.40
codegen_flags: <defaults>
</compile_context>

<pallas_src>
import functools

import jax
import jax.numpy as jnp
import numpy as np
from jax.experimental import pallas as pl
from jax.experimental.pallas import tpu as pltpu


def _wscale_kernel(x_ref, b_ref, o_ref, *, scale):
    # x_ref: (tm, tn) tile; b_ref is (tm, 1) or (1, tn) f32 and broadcasts.
    xf = x_ref[...].astype(jnp.float32)
    o_ref[...] = (xf * scale + b_ref[...]).astype(o_ref.dtype)


def _chip_config():
    """Generation-dependent tile budget / scoped-VMEM limit / megacore flag."""
    kind = ""
    try:
        kind = jax.devices()[0].device_kind.lower()
    except Exception:
        pass
    if ("v7" in kind) or ("7x" in kind):
        # v7x: 64 MiB physical VMEM per TC, 2 TCs -> keep blocks modest.
        return {"target_bytes": 4 << 20, "vmem_limit": 32 * 1024 * 1024,
                "two_cores": True}
    if ("v5" in kind) or ("v6" in kind):
        # v5e/v6e: 128 MiB VMEM, single TC -> bigger blocks amortize the
        # ~0.35 us per-grid-step overhead and stay on the HBM roofline plateau.
        return {"target_bytes": 8 << 20, "vmem_limit": 64 * 1024 * 1024,
                "two_cores": False}
    # Unknown chip: conservative defaults.
    return {"target_bytes": 4 << 20, "vmem_limit": 32 * 1024 * 1024,
            "two_cores": False}


def _choose_tiles(rows, cols, itemsize, *, target_bytes, two_cores):
    """Pick a lane-dense (tm, tn) block of roughly `target_bytes`."""
    # Sublane packing: 8 rows/vreg for 4-byte, 16 for 2-byte, 32 for 1-byte.
    pack = 8 * max(1, 4 // max(1, itemsize))

    # Lane (last) dim: multiple of 128, or the full extent.
    if cols % 128 == 0:
        max_tn = max(128, (target_bytes // (pack * itemsize)) // 128 * 128)
        tn = min(cols, max_tn)
    else:
        # Full extent (may incur masked edge stores / exceed the budget for
        # very large non-128-multiple extents; the layout picker avoids this
        # whenever C*H*W is lane-dense).
        tn = cols

    # Sublane (row) dim: multiple of the pack factor, or the full extent.
    if rows <= pack:
        tm = rows
    else:
        tm = max(pack, (target_bytes // (tn * itemsize)) // pack * pack)
        tm = min(tm, rows // pack * pack)

    # v7x only: guarantee >= 2 balanced blocks so both TensorCores get work.
    if two_cores and pl.cdiv(rows, tm) * pl.cdiv(cols, tn) == 1:
        if rows >= 2 * pack and (tm // 2) // pack * pack >= pack:
            tm = (tm // 2) // pack * pack
        elif cols % 256 == 0 and tn >= 256:
            tn = (tn // 2) // 128 * 128
    return tm, tn


def wscale_forward(x_nchw, b, *, gain=np.sqrt(2.0), fan_in=None, donate=False):
    """y = x * (gain / sqrt(fan_in)) + b (per channel), via a Pallas TPU kernel.

    NOTE: PyTorch's PGGAN WScaleLayer derives fan_in from the preceding
    layer's weight (in_ch * kh * kw); pass it explicitly to match.
    """
    B, C, H, W = x_nchw.shape
    if fan_in is None:
        fan_in = C
    scale = float(gain / np.sqrt(fan_in))

    hw = H * W
    cfg = _chip_config()
    itemsize = jnp.dtype(x_nchw.dtype).itemsize
    bf32 = b.astype(jnp.float32)

    # Layout selection (both are free views of contiguous NCHW).
    if hw % 128 == 0:
        rows, cols = B * C, hw
        x2d = x_nchw.reshape(rows, cols)
        # Per-row bias column: row r <-> channel r % C.
        b2d = jnp.broadcast_to(bf32.reshape(1, C), (B, C)).reshape(rows, 1)

        def bias_spec(tm, tn):
            return pl.BlockSpec((tm, 1), lambda i, j: (i, 0))
    else:
        # Lane-dense fallback for small / non-aligned H*W: channel bias
        # repeated H*W times along the lane axis, broadcast along sublanes.
        rows, cols = B, C * hw
        x2d = x_nchw.reshape(rows, cols)
        b2d = jnp.repeat(bf32, hw).reshape(1, cols)

        def bias_spec(tm, tn):
            return pl.BlockSpec((1, tn), lambda i, j: (0, j))

    tm, tn = _choose_tiles(rows, cols, itemsize,
                           target_bytes=cfg["target_bytes"],
                           two_cores=cfg["two_cores"])
    # Grid order: rows (i) outer, cols (j) inner -> bias block index constant
    # across consecutive inner steps (its DMA is skipped in layout 1).
    grid = (pl.cdiv(rows, tm), pl.cdiv(cols, tn))

    cost = pl.CostEstimate(
        flops=2 * rows * cols,
        transcendentals=0,
        bytes_accessed=2 * rows * cols * itemsize + int(b2d.size) * 4,
    )

    out2d = pl.pallas_call(
        functools.partial(_wscale_kernel, scale=scale),
        out_shape=jax.ShapeDtypeStruct((rows, cols), x2d.dtype),
        grid_spec=pltpu.PrefetchScalarGridSpec(
            num_scalar_prefetch=0,
            grid=grid,
            in_specs=[
                pl.BlockSpec((tm, tn), lambda i, j: (i, j)),
                bias_spec(tm, tn),
            ],
            out_specs=pl.BlockSpec((tm, tn), lambda i, j: (i, j)),
        ),
        compiler_params=pltpu.CompilerParams(
            dimension_semantics=("parallel", "parallel"),
            vmem_limit_bytes=cfg["vmem_limit"],
        ),
        cost_estimate=cost,
        # Footprint win when the caller donates x (no second full-size HBM buf).
        input_output_aliases={0: 0} if donate else {},
    )(x2d, b2d)

    return out2d.reshape(B, C, H, W)


if __name__ == "__main__":
    key = jax.random.PRNGKey(0)
    kx, kb, kx2 = jax.random.split(key, 3)

    # Primary check: H*W = 256 (lane-dense layout 1).
    B, C, H, W = 2, 4, 16, 16
    x = jax.random.normal(kx, (B, C, H, W), dtype=jnp.float32)
    b = jax.random.normal(kb, (C,), dtype=jnp.float32)  # nn.Parameter(torch.randn(size))

    out = wscale_forward(x, b, gain=np.sqrt(2.0), fan_in=C)
    out = jax.block_until_ready(out)

    scale = np.sqrt(2.0) / np.sqrt(C)
    ref = x * scale + b.reshape(1, C, 1, 1)
    assert out.shape == (B, C, H, W)
    np.testing.assert_allclose(np.asarray(out), np.asarray(ref),
                               rtol=1e-6, atol=1e-6)

    # Fallback-layout check: H*W = 64 (< 128) -> (B, C*H*W) lane-dense path.
    H2 = W2 = 8
    x_small = jax.random.normal(kx2, (B, C, H2, W2), dtype=jnp.float32)
    out_small = jax.block_until_ready(
        wscale_forward(x_small, b, gain=np.sqrt(2.0), fan_in=C))
    ref_small = x_small * scale + b.reshape(1, C, 1, 1)
    np.testing.assert_allclose(np.asarray(out_small), np.asarray(ref_small),
                               rtol=1e-6, atol=1e-6)

    print("KERNEL_OK")
</pallas_src>

<mosaic_0001>
module attributes {stable_mosaic.version = 11 : i64} {
  func.func @_wscale_kernel(%arg0: i32, %arg1: i32, %arg2: memref<8x256xf32, #tpu.memory_space<vmem>>, %arg3: memref<8x1xf32, #tpu.memory_space<vmem>>, %arg4: memref<8x256xf32, #tpu.memory_space<vmem>>) attributes {dimension_semantics = [#tpu.dimension_semantics<parallel>, #tpu.dimension_semantics<parallel>], iteration_bounds = array<i64: 1, 1>, scalar_prefetch = 0 : i64, scratch_operands = 0 : i64, tpu.core_type = #tpu.core_type<tc>, window_params = [{transform_indices = @transform_0, window_bounds = array<i64: 8, 256>}, {transform_indices = @transform_1, window_bounds = array<i64: 8, 1>}, {transform_indices = @transform_2, window_bounds = array<i64: 8, 256>}]} {
    %c0 = arith.constant 0 : index
    %c0_0 = arith.constant 0 : index
    %0 = vector.load %arg2[%c0, %c0_0] : memref<8x256xf32, #tpu.memory_space<vmem>>, vector<8x256xf32>
    %cst = arith.constant 0.707106769 : f32
    %1 = vector.broadcast %cst : f32 to vector<8x256xf32>
    %2 = arith.mulf %0, %1 : vector<8x256xf32>
    %c0_1 = arith.constant 0 : index
    %c0_2 = arith.constant 0 : index
    %3 = vector.load %arg3[%c0_1, %c0_2] : memref<8x1xf32, #tpu.memory_space<vmem>>, vector<8x1xf32>
    %4 = vector.broadcast %3 : vector<8x1xf32> to vector<8x256xf32>
    %5 = arith.addf %2, %4 : vector<8x256xf32>
    %c0_3 = arith.constant 0 : index
    %c0_4 = arith.constant 0 : index
    %6 = vector.load %arg4[%c0_3, %c0_4] : memref<8x256xf32, #tpu.memory_space<vmem>>, vector<8x256xf32>
    tpu.vector_store %arg4[%c0_3, %c0_4], %5 {strides = array<i32>} : memref<8x256xf32, #tpu.memory_space<vmem>>, vector<8x256xf32>,
    return
  }
  func.func @transform_0(%arg0: i32, %arg1: i32) -> (i32, i32) {
    %c0_i32 = arith.constant 0 : i32
    return %arg0, %arg1 : i32, i32
  }
  func.func @transform_1(%arg0: i32, %arg1: i32) -> (i32, i32) {
    %c0_i32 = arith.constant 0 : i32
    %c0_i32_0 = arith.constant 0 : i32
    return %arg0, %c0_i32 : i32, i32
  }
  func.func @transform_2(%arg0: i32, %arg1: i32) -> (i32, i32) {
    %c0_i32 = arith.constant 0 : i32
    return %arg0, %arg1 : i32, i32
  }
}

</mosaic_0001>

<bundles_post_ra>
// kernel: tpu_custom_call.1
= control target key start
LH: loop header
LB: loop body
LE: loop exit
PB: predicated region body
PF: predicated region fallthrough
CT: control target
= control target key end

     0   :  { %7 = vsyncpa [#allocation3], 0  ;;  %s140_s0 = inlined_call_operand.hbm [shape: f32[8,256], index: 0, kind: input, shape index: {}]   ;;  %s141_s1 = inlined_call_operand.vmem [shape: f32[8,1], index: 1, kind: input, shape index: {}]   ;;  %s142_s2 = inlined_call_operand.hbm [shape: f32[8,256], index: 2, kind: output, shape index: {}]  }
   0x1   :  { %8 = vsyncpa [#allocation4], 0  ;;  %s14_s11 = sshll.u32 %s140_s0, 4  ;;  %s113_s12 = smov [#allocation2]   ;;  %s15_s11 = int_to_ptr.hbm [resolvable:$true] %s14_s11 }
   0x2   :  { %s16_s13 = sshll.u32 %s113_s12, 4  ;;  %s17_s13 = int_to_ptr.vmem [resolvable:$true] %s16_s13 }
   0x3   :  { %19 = dma.hbm_to_vmem [thread:$0]  %s15_s11, 256, %s17_s13, [#allocation3]  }
   0x4   :  { %109 = dma.done.wait [#allocation3], 256  }
   0x5   :  { %110 = vsyncadd [#allocation3], 4294967040  ;;  %v114_v0 = vmov 0   ;;  %v30_v1 = vld [vmem:[%s141_s1] sm:$0xff]  ;;  %v27_v3 = vld [vmem:[#allocation2 + $0x8] sm:$0xff]  ;;  %s115_s16 = smov [#allocation5]  }
   0x6   :  { %60 = vset.pattern.permute.xlu0 %v114_v0  ;;  %v26_v2 = vld [vmem:[#allocation2] sm:$0xff]  ;;  %v29_v5 = vmul.f32 0.70710677, %v27_v3  ;;  %s45_s0 = sshll.u32 %s115_s16, 4  ;;  %s47_s19 = sshll.u32 %s142_s2, 4  ;;  %s46_s0 = int_to_ptr.vmem [resolvable:$true] %s45_s0  ;;  %s48_s19 = int_to_ptr.hbm [resolvable:$true] %s47_s19 }
   0x7   :  { %33 = vperm.xlu0 %60, %v30_v1   ;;  %v28_v4 = vmul.f32 0.70710677, %v26_v2 }
  0x79   :  { %v34_v6 = vpop.permute.xlu0 %33 }
  0x7a   :  { %v36_v7 = vadd.f32 %v34_v6, %v28_v4  ;;  %v37_v8 = vadd.f32 %v34_v6, %v29_v5 }
  0x7c   :  { %38 = vst [vmem:[#allocation5] sm:$0xff] %v36_v7 }
  0x7d   :  { %39 = vst [vmem:[#allocation5 + $0x8] sm:$0xff] %v37_v8 }
  0x7e   :  { %50 = dma.vmem_to_hbm [thread:$0]  %s46_s0, 256, %s48_s19, [#allocation4]  }
  0x7f   :  { %111 = dma.done.wait [#allocation4], 256  }
  0x80   :  { %112 = vsyncadd [#allocation4], 4294967040 }
  0x81   :  { %55 = vsyncpa [#allocation3], 1 }
  0x82   :  { %56 = vsyncpa [#allocation4], 1 }

</bundles_post_ra>
